<compile_context>
chip_gen: v5e
topology: v5e:2x2
jax: 0.10.0
libtpu: 0.0.40
codegen_flags: <defaults>
</compile_context>

<pallas_src>
import functools

import jax
import jax.numpy as jnp
from jax.experimental import pallas as pl
from jax.experimental.pallas import tpu as pltpu


# ~1 MiB of fp32 elements per x tile. Per grid step the working set is roughly
# 2x in + 2x out (double-buffered, native dtype) + ~3x fp32 temporaries, which
# keeps every generation (v7x: 64 MiB VMEM/TC) comfortably inside budget while
# staying on the ~85% HBM-roofline plateau reached by >=512-wide tiles.
_TARGET_TILE_ELEMS = 256 * 1024
_HARD_TILE_FACTOR = 4  # single-tile-per-group allowed up to 4x the target


def _vmem_limit_bytes(need_bytes):
    """Generation-aware scoped-VMEM request: cover what we allocate, capped at
    3/4 of physical VMEM (48 MiB on v7x, 96 MiB on v5e/v6e) so Mosaic keeps
    headroom for its internal scratch."""
    try:
        cap = int(getattr(pltpu.get_tpu_info(), "vmem_capacity_bytes", 0))
    except Exception:
        cap = 0
    if cap <= 0:
        cap = 64 * 1024 * 1024  # conservative: assume the smallest (v7x)
    hi = (cap * 3) // 4
    return int(min(hi, max(32 * 1024 * 1024, int(need_bytes))))


# ---------------------------------------------------------------------------
# Main path: one whole group (or several) per tile, single fused pass.
# ---------------------------------------------------------------------------
def _gbn_kernel(x_ref, gamma_ref, beta_ref, o_ref, *, eps, g_tile):
    """Fused group-norm on one (g_tile, ...) tile.

    Statistics (sum, sum of squares) are accumulated in a single sweep, then
    normalization + affine are folded into out = x*scale + shift.
    gamma_ref / beta_ref hold the full tiny per-group parameter arrays
    (constant index_map => DMA'd once, resident in VMEM); we slice our rows.
    """
    x = x_ref[...]                          # native dtype block
    xf = x.astype(jnp.float32)

    n_elem = 1
    for d in xf.shape[1:]:
        n_elem *= d

    # One fused pass over the tile: sum and sum-of-squares of trailing axes.
    s = xf
    q = xf * xf
    for ax in range(xf.ndim - 1, 0, -1):
        s = jnp.sum(s, axis=ax, keepdims=True)
        q = jnp.sum(q, axis=ax, keepdims=True)

    mean = s * jnp.float32(1.0 / n_elem)
    # Unbiased variance (torch.std default): (sum(x^2) - n*mean^2) / (n - 1).
    var = jnp.maximum(q - s * mean, 0.0) * jnp.float32(1.0 / (n_elem - 1))
    inv = 1.0 / (jnp.sqrt(var) + jnp.float32(eps))   # one divide per group

    if gamma_ref.shape[0] == g_tile:        # all groups live in this tile
        gamma = gamma_ref[...]
        beta = beta_ref[...]
    else:
        g0 = pl.multiple_of(pl.program_id(1) * g_tile, g_tile)
        gamma = gamma_ref[pl.ds(g0, g_tile)]
        beta = beta_ref[pl.ds(g0, g_tile)]

    scale = gamma.astype(jnp.float32) * inv
    shift = beta.astype(jnp.float32) - mean * scale

    if x.dtype in (jnp.bfloat16, jnp.float16):
        # Dominant elementwise pass in the native 16-bit dtype (bf16 VALU on
        # v6e/v7x); per-group scale/shift are cast once.
        o_ref[...] = (x * scale.astype(x.dtype)
                      + shift.astype(x.dtype)).astype(o_ref.dtype)
    else:
        o_ref[...] = (xf * scale + shift).astype(o_ref.dtype)


# ---------------------------------------------------------------------------
# Fallback path: group too large for one tile -> two sweeps, L tiled.
# ---------------------------------------------------------------------------
def _stats_kernel(x_ref, sum_ref, sq_ref, *, n_cols):
    """Accumulate per-row sum / sum-of-squares across the 'arbitrary' column
    grid axis. Output blocks are resident accumulators (constant col index)."""
    @pl.when(pl.program_id(1) == 0)
    def _():
        sum_ref[...] = jnp.zeros_like(sum_ref)
        sq_ref[...] = jnp.zeros_like(sq_ref)

    xf = x_ref[...].astype(jnp.float32)
    c_tile = xf.shape[1]
    if n_cols % c_tile != 0:
        # Mask the padded tail of the last column block.
        col = (pl.program_id(1) * c_tile
               + jax.lax.broadcasted_iota(jnp.int32, xf.shape, 1))
        xf = jnp.where(col < n_cols, xf, 0.0)
    sum_ref[...] += jnp.sum(xf, axis=1, keepdims=True)
    sq_ref[...] += jnp.sum(xf * xf, axis=1, keepdims=True)


def _affine_kernel(x_ref, scale_ref, shift_ref, o_ref):
    """out = x * scale + shift with per-row (per group / per channel) params."""
    x = x_ref[...]
    if x.dtype in (jnp.bfloat16, jnp.float16):
        o_ref[...] = (x * scale_ref[...].astype(x.dtype)
                      + shift_ref[...].astype(x.dtype)).astype(o_ref.dtype)
    else:
        o_ref[...] = (x.astype(jnp.float32) * scale_ref[...]
                      + shift_ref[...]).astype(o_ref.dtype)


# ---------------------------------------------------------------------------
# Tile pickers.
# ---------------------------------------------------------------------------
def _pick_g_tile(G, per_group_elems, need_mult8, pack, prefer_split,
                 target_elems, hard_elems):
    """Largest group tile (divisor of G) whose fp32 footprint fits the target.
    Returns None when even a single group overflows -> use the L-tiled path."""
    step = 8 * pack if need_mult8 else 1
    cands = [g for g in range(step, G, step) if G % g == 0] + [G]
    fitting = [g for g in cands if g * per_group_elems <= target_elems]
    if fitting:
        best = max(fitting)
        if prefer_split and best == G:
            # Expose >= 2 grid steps for megacore (v7x) when batch alone won't.
            sub = [g for g in fitting
                   if g < G and g * per_group_elems >= 64 * 128]
            if sub:
                best = max(sub)
        return best
    ok = [g for g in cands if g * per_group_elems <= hard_elems]
    if ok:
        return min(ok)
    return None


def _pick_rows(rows, c_tile, target_elems, pack):
    step = 8 * pack
    if rows <= step:
        return rows
    budget = max(step, target_elems // max(c_tile, 1))
    if budget >= rows:
        return rows
    return max(step, (budget // step) * step)


def _pick_cols(n_cols, rows_nominal, target_elems):
    budget = max(128, target_elems // max(rows_nominal, 1))
    if n_cols <= budget:
        return n_cols
    return max(128, (budget // 128) * 128)


def _gbn_l_tiled(x, gamma, beta, G, eps, case_a, K, ch_of_group, target_elems):
    """Two-sweep path for groups too large for a single VMEM tile (e.g. big
    H*W on v7x): sweep 1 accumulates per-group sum/sumsq, host computes the
    tiny per-row scale/shift, sweep 2 applies the folded affine."""
    N, C, H, W = x.shape
    HW = H * W
    L = (C * HW) // G
    rows = N * G
    itemsize = jnp.dtype(x.dtype).itemsize
    pack = max(1, 4 // max(itemsize, 1))

    x2 = x.reshape(rows, L)

    # Sweep 1: per-group statistics, L tiled along an 'arbitrary' grid axis.
    c_tile = _pick_cols(L, min(rows, 8 * pack), target_elems)
    r_tile = _pick_rows(rows, c_tile, target_elems, pack)
    need = (2 * r_tile * c_tile * itemsize + 2 * r_tile * c_tile * 4
            + 8 * r_tile * 4 + (2 << 20))
    sums, sqs = pl.pallas_call(
        functools.partial(_stats_kernel, n_cols=L),
        out_shape=(jax.ShapeDtypeStruct((rows, 1), jnp.float32),
                   jax.ShapeDtypeStruct((rows, 1), jnp.float32)),
        grid=(pl.cdiv(rows, r_tile), pl.cdiv(L, c_tile)),
        in_specs=[pl.BlockSpec((r_tile, c_tile), lambda r, l: (r, l))],
        out_specs=(pl.BlockSpec((r_tile, 1), lambda r, l: (r, 0)),
                   pl.BlockSpec((r_tile, 1), lambda r, l: (r, 0))),
        compiler_params=pltpu.CompilerParams(
            dimension_semantics=("parallel", "arbitrary"),
            vmem_limit_bytes=_vmem_limit_bytes(need)),
    )(x2)

    # Tiny host-side math: mean, unbiased std, folded scale/shift per row.
    mean = sums * (1.0 / L)                                      # (rows, 1)
    var = jnp.maximum(sqs - sums * mean, 0.0) * (1.0 / (L - 1))
    inv = 1.0 / (jnp.sqrt(var) + jnp.float32(eps))
    mean = mean.reshape(N, G)
    inv = inv.reshape(N, G)

    if case_a:
        # Each group lies inside one channel -> one scale/shift per (n, group).
        gamma_grp = gamma[ch_of_group]                           # (G,)
        beta_grp = beta[ch_of_group]
        scale = gamma_grp[None, :] * inv                         # (N, G)
        shift = beta_grp[None, :] - mean * scale
        rows2, len2 = rows, L
        x3 = x2
    else:
        # Each group spans K whole channels -> one scale/shift per (n, channel).
        inv_c = jnp.repeat(inv, K, axis=1)                       # (N, C)
        mean_c = jnp.repeat(mean, K, axis=1)
        scale = gamma[None, :] * inv_c
        shift = beta[None, :] - mean_c * scale
        rows2, len2 = N * C, HW
        x3 = x.reshape(rows2, len2)
    scale = scale.reshape(rows2, 1).astype(jnp.float32)
    shift = shift.reshape(rows2, 1).astype(jnp.float32)

    # Sweep 2: out = x * scale + shift.
    c_tile2 = _pick_cols(len2, min(rows2, 8 * pack), target_elems)
    r_tile2 = _pick_rows(rows2, c_tile2, target_elems, pack)
    need2 = (4 * r_tile2 * c_tile2 * itemsize + 2 * r_tile2 * c_tile2 * 4
             + 8 * r_tile2 * 4 + (2 << 20))
    out = pl.pallas_call(
        _affine_kernel,
        out_shape=jax.ShapeDtypeStruct((rows2, len2), x.dtype),
        grid=(pl.cdiv(rows2, r_tile2), pl.cdiv(len2, c_tile2)),
        in_specs=[pl.BlockSpec((r_tile2, c_tile2), lambda r, l: (r, l)),
                  pl.BlockSpec((r_tile2, 1), lambda r, l: (r, 0)),
                  pl.BlockSpec((r_tile2, 1), lambda r, l: (r, 0))],
        out_specs=pl.BlockSpec((r_tile2, c_tile2), lambda r, l: (r, l)),
        compiler_params=pltpu.CompilerParams(
            dimension_semantics=("parallel", "parallel"),
            vmem_limit_bytes=_vmem_limit_bytes(need2)),
    )(x3, scale, shift)
    return out.reshape(N, C, H, W)


# ---------------------------------------------------------------------------
# Public wrapper.
# ---------------------------------------------------------------------------
def group_batchnorm2d(x, gamma, beta, group_num=16, eps=1e-10,
                      _target_elems=None):
    """x: (N, C, H, W); gamma/beta: (C,) or (C,1,1). Returns (N, C, H, W)."""
    N, C, H, W = x.shape
    HW = H * W
    G = group_num
    assert (C * HW) % G == 0
    L = (C * HW) // G
    assert L > 1, "unbiased std needs at least 2 elements per group"
    gamma = jnp.asarray(gamma).reshape(C)
    beta = jnp.asarray(beta).reshape(C)

    target_elems = _TARGET_TILE_ELEMS if _target_elems is None else _target_elems
    hard_elems = _HARD_TILE_FACTOR * target_elems

    itemsize = jnp.dtype(x.dtype).itemsize
    pack = max(1, 4 // max(itemsize, 1))

    case_a = (HW % L == 0)                  # each group inside one channel
    case_b = (not case_a) and (C % G == 0)  # each group spans K whole channels
    if not (case_a or case_b):
        # TODO(synk): groups straddling channel boundaries need a per-element
        # channel map; not expressible with tiny per-group parameters.
        raise NotImplementedError(
            "GroupBatchnorm2d Pallas kernel requires group_num % C == 0 or "
            "C % group_num == 0")

    if case_a:
        groups_per_channel = G // C          # integer when HW % L == 0
        ch_of_group = jnp.arange(G, dtype=jnp.int32) // groups_per_channel
        K = None
        if L % 128 == 0:
            # Lane-dense: last block dim is exactly 128 -> unmasked stores.
            tail = (L // 128, 128)
            p_tail = (1, 1)
            need_mult8 = False
        else:
            tail = (L,)
            p_tail = (1,)
            need_mult8 = True                # group axis sits in the sublane dim
        gamma_g = gamma[ch_of_group].reshape((G,) + p_tail).astype(jnp.float32)
        beta_g = beta[ch_of_group].reshape((G,) + p_tail).astype(jnp.float32)
    else:
        K = C // G
        ch_of_group = None
        if HW % 128 == 0:
            # Lane-dense: (K*HW//128, 128) rows; gamma constant per row.
            R = (K * HW) // 128
            rep = HW // 128
            tail = (R, 128)
            p_tail = (R, 1)
            gamma_g = jnp.repeat(gamma.reshape(G, K), rep, axis=1)
            beta_g = jnp.repeat(beta.reshape(G, K), rep, axis=1)
            gamma_g = gamma_g.reshape((G,) + p_tail).astype(jnp.float32)
            beta_g = beta_g.reshape((G,) + p_tail).astype(jnp.float32)
            need_mult8 = False
        else:
            tail = (K, HW)
            p_tail = (K, 1)
            gamma_g = gamma.reshape((G,) + p_tail).astype(jnp.float32)
            beta_g = beta.reshape((G,) + p_tail).astype(jnp.float32)
            need_mult8 = False

    g_tile = _pick_g_tile(G, L, need_mult8, pack, prefer_split=(N == 1),
                          target_elems=target_elems, hard_elems=hard_elems)
    if g_tile is None:
        # A single group does not fit the VMEM tile budget (large H*W,
        # especially on v7x's 64 MiB VMEM): two-sweep L-tiled path.
        return _gbn_l_tiled(x, gamma, beta, G, eps, case_a, K, ch_of_group,
                            target_elems)

    xg = x.reshape((N, G) + tail)
    nd = len(tail)
    x_spec = pl.BlockSpec((pl.Squeezed(), g_tile) + tail,
                          lambda n, g, nd=nd: (n, g) + (0,) * nd)
    # Constant index_map -> the tiny full gamma/beta arrays are DMA'd once and
    # stay resident in VMEM for the whole call (no per-step sub-512B DMAs).
    p_spec = pl.BlockSpec(gamma_g.shape,
                          lambda n, g, nd=gamma_g.ndim: (0,) * nd)

    blk_native = g_tile * L * itemsize
    blk_f32 = g_tile * L * 4
    param_bytes = 2 * 2 * int(gamma_g.size) * 4
    need = 4 * blk_native + 3 * blk_f32 + param_bytes + (2 << 20)

    out = pl.pallas_call(
        functools.partial(_gbn_kernel, eps=eps, g_tile=g_tile),
        out_shape=jax.ShapeDtypeStruct(xg.shape, x.dtype),
        grid=(N, G // g_tile),
        in_specs=[x_spec, p_spec, p_spec],
        out_specs=x_spec,
        compiler_params=pltpu.CompilerParams(
            dimension_semantics=("parallel", "parallel"),
            vmem_limit_bytes=_vmem_limit_bytes(need)),
    )(xg, gamma_g, beta_g)

    return out.reshape(N, C, H, W)


# ---------------------------------------------------------------------------
# Reference and self-test.
# ---------------------------------------------------------------------------
def _reference(x, gamma, beta, group_num=16, eps=1e-10):
    N, C, H, W = x.shape
    xg = x.reshape(N, group_num, -1)
    mean = jnp.mean(xg, axis=2, keepdims=True)
    std = jnp.std(xg, axis=2, keepdims=True, ddof=1)  # torch.std is unbiased
    xn = ((xg - mean) / (std + eps)).reshape(N, C, H, W)
    return xn * gamma.reshape(C, 1, 1) + beta.reshape(C, 1, 1)


if __name__ == "__main__":
    key = jax.random.PRNGKey(0)
    kx, kg, kb, kx2 = jax.random.split(key, 4)

    # 1) Module-default setup: N=2, C=4, H=W=16, group_num=16 (groups inside a
    #    channel), gamma=ones, beta=zeros.
    N, C, H, W, G, eps = 2, 4, 16, 16, 16, 1e-10
    x = jax.random.normal(kx, (N, C, H, W), dtype=jnp.float32)
    gamma0 = jnp.ones((C, 1, 1), jnp.float32)
    beta0 = jnp.zeros((C, 1, 1), jnp.float32)
    out0 = jax.block_until_ready(group_batchnorm2d(x, gamma0, beta0, G, eps))
    ref0 = _reference(x, gamma0.reshape(C), beta0.reshape(C), G, eps)
    assert out0.shape == (N, C, H, W)
    assert jnp.allclose(out0, ref0, atol=1e-5, rtol=1e-5)

    # 2) Non-trivial affine parameters on the same layout.
    gamma1 = 1.0 + 0.1 * jax.random.normal(kg, (C,), jnp.float32)
    beta1 = 0.1 * jax.random.normal(kb, (C,), jnp.float32)
    out1 = jax.block_until_ready(group_batchnorm2d(x, gamma1, beta1, G, eps))
    ref1 = _reference(x, gamma1, beta1, G, eps)
    assert jnp.allclose(out1, ref1, atol=1e-5, rtol=1e-5)

    # 3) C % group_num == 0 layout (each group spans K=2 whole channels),
    #    lane-dense (HW % 128 == 0) branch.
    C2, G2 = 8, 4
    x2 = jax.random.normal(kx2, (N, C2, H, W), dtype=jnp.float32)
    gamma2 = 1.0 + 0.1 * jax.random.normal(kg, (C2,), jnp.float32)
    beta2 = 0.1 * jax.random.normal(kb, (C2,), jnp.float32)
    out2 = jax.block_until_ready(group_batchnorm2d(x2, gamma2, beta2, G2, eps))
    ref2 = _reference(x2, gamma2, beta2, G2, eps)
    assert jnp.allclose(out2, ref2, atol=1e-5, rtol=1e-5)

    # 4) Exercise the two-sweep L-tiled fallback (the path large H*W takes on
    #    v7x) on a small problem by shrinking the tile budget.
    H3 = W3 = 32
    x3 = jax.random.normal(kx, (N, C, H3, W3), dtype=jnp.float32)
    out3 = jax.block_until_ready(
        group_batchnorm2d(x3, gamma1, beta1, G, eps, _target_elems=32))
    ref3 = _reference(x3, gamma1, beta1, G, eps)
    assert jnp.allclose(out3, ref3, atol=1e-5, rtol=1e-5)

    print("KERNEL_OK")
</pallas_src>

<mosaic_0001>
module attributes {stable_mosaic.version = 11 : i64} {
  func.func @_gbn_kernel(%arg0: i32, %arg1: i32, %arg2: memref<1x16x64xf32, #tpu.memory_space<vmem>>, %arg3: memref<16x1xf32, #tpu.memory_space<vmem>>, %arg4: memref<16x1xf32, #tpu.memory_space<vmem>>, %arg5: memref<1x16x64xf32, #tpu.memory_space<vmem>>) attributes {dimension_semantics = [#tpu.dimension_semantics<parallel>, #tpu.dimension_semantics<parallel>], iteration_bounds = array<i64: 2, 1>, scalar_prefetch = 0 : i64, scratch_operands = 0 : i64, tpu.core_type = #tpu.core_type<tc>, window_params = [{transform_indices = @transform_0, window_bounds = array<i64: 1, 16, 64>}, {pipeline_mode = #tpu.pipeline_mode<synchronous>, transform_indices = @transform_1, window_bounds = array<i64: 16, 1>}, {pipeline_mode = #tpu.pipeline_mode<synchronous>, transform_indices = @transform_2, window_bounds = array<i64: 16, 1>}, {transform_indices = @transform_3, window_bounds = array<i64: 1, 16, 64>}]} {
    %c0 = arith.constant 0 : index
    %c0_0 = arith.constant 0 : index
    %c0_1 = arith.constant 0 : index
    %0 = vector.load %arg2[%c0, %c0_0, %c0_1] : memref<1x16x64xf32, #tpu.memory_space<vmem>>, vector<1x16x64xf32>
    %1 = vector.shape_cast %0 : vector<1x16x64xf32> to vector<16x64xf32>
    %2 = arith.mulf %1, %1 : vector<16x64xf32>
    %cst = arith.constant dense<0.000000e+00> : vector<16xf32>
    %3 = vector.multi_reduction <add>, %1, %cst [1] : vector<16x64xf32> to vector<16xf32>
    %4 = vector.shape_cast %3 : vector<16xf32> to vector<16x1xf32>
    %cst_2 = arith.constant dense<0.000000e+00> : vector<16xf32>
    %5 = vector.multi_reduction <add>, %2, %cst_2 [1] : vector<16x64xf32> to vector<16xf32>
    %6 = vector.shape_cast %5 : vector<16xf32> to vector<16x1xf32>
    %cst_3 = arith.constant 1.562500e-02 : f32
    %7 = vector.broadcast %cst_3 : f32 to vector<16x1xf32>
    %8 = arith.mulf %4, %7 : vector<16x1xf32>
    %9 = arith.mulf %4, %8 : vector<16x1xf32>
    %10 = arith.subf %6, %9 : vector<16x1xf32>
    %cst_4 = arith.constant 0.000000e+00 : f32
    %11 = vector.broadcast %cst_4 : f32 to vector<16x1xf32>
    %12 = arith.maximumf %10, %11 : vector<16x1xf32>
    %cst_5 = arith.constant 0.0158730168 : f32
    %13 = vector.broadcast %cst_5 : f32 to vector<16x1xf32>
    %14 = arith.mulf %12, %13 : vector<16x1xf32>
    %15 = math.sqrt %14 : vector<16x1xf32>
    %cst_6 = arith.constant 1.000000e-10 : f32
    %16 = vector.broadcast %cst_6 : f32 to vector<16x1xf32>
    %17 = arith.addf %15, %16 : vector<16x1xf32>
    %cst_7 = arith.constant 1.000000e+00 : f32
    %18 = vector.broadcast %cst_7 : f32 to vector<16x1xf32>
    %19 = arith.divf %18, %17 : vector<16x1xf32>
    %c0_8 = arith.constant 0 : index
    %c0_9 = arith.constant 0 : index
    %20 = vector.load %arg3[%c0_8, %c0_9] : memref<16x1xf32, #tpu.memory_space<vmem>>, vector<16x1xf32>
    %c0_10 = arith.constant 0 : index
    %c0_11 = arith.constant 0 : index
    %21 = vector.load %arg4[%c0_10, %c0_11] : memref<16x1xf32, #tpu.memory_space<vmem>>, vector<16x1xf32>
    %22 = arith.mulf %20, %19 : vector<16x1xf32>
    %23 = arith.mulf %8, %22 : vector<16x1xf32>
    %24 = arith.subf %21, %23 : vector<16x1xf32>
    %25 = vector.broadcast %22 : vector<16x1xf32> to vector<16x64xf32>
    %26 = arith.mulf %1, %25 : vector<16x64xf32>
    %27 = vector.broadcast %24 : vector<16x1xf32> to vector<16x64xf32>
    %28 = arith.addf %26, %27 : vector<16x64xf32>
    %c0_12 = arith.constant 0 : index
    %c0_13 = arith.constant 0 : index
    %c0_14 = arith.constant 0 : index
    %29 = vector.load %arg5[%c0_12, %c0_13, %c0_14] : memref<1x16x64xf32, #tpu.memory_space<vmem>>, vector<1x16x64xf32>
    %30 = vector.shape_cast %29 : vector<1x16x64xf32> to vector<16x64xf32>
    %31 = vector.shape_cast %28 : vector<16x64xf32> to vector<1x16x64xf32>
    tpu.vector_store %arg5[%c0_12, %c0_13, %c0_14], %31 {strides = array<i32>} : memref<1x16x64xf32, #tpu.memory_space<vmem>>, vector<1x16x64xf32>,
    return
  }
  func.func @transform_0(%arg0: i32, %arg1: i32) -> (i32, i32, i32) {
    %c0_i32 = arith.constant 0 : i32
    %c0_i32_0 = arith.constant 0 : i32
    return %arg0, %arg1, %c0_i32 : i32, i32, i32
  }
  func.func @transform_1(%arg0: i32, %arg1: i32) -> (i32, i32) {
    %c0_i32 = arith.constant 0 : i32
    %c0_i32_0 = arith.constant 0 : i32
    %c0_i32_1 = arith.constant 0 : i32
    return %c0_i32, %c0_i32_0 : i32, i32
  }
  func.func @transform_2(%arg0: i32, %arg1: i32) -> (i32, i32) {
    %c0_i32 = arith.constant 0 : i32
    %c0_i32_0 = arith.constant 0 : i32
    %c0_i32_1 = arith.constant 0 : i32
    return %c0_i32, %c0_i32_0 : i32, i32
  }
  func.func @transform_3(%arg0: i32, %arg1: i32) -> (i32, i32, i32) {
    %c0_i32 = arith.constant 0 : i32
    %c0_i32_0 = arith.constant 0 : i32
    return %arg0, %arg1, %c0_i32 : i32, i32, i32
  }
}

</mosaic_0001>

<bundles_post_ra>
// kernel: tpu_custom_call.1
= control target key start
LH: loop header
LB: loop body
LE: loop exit
PB: predicated region body
PF: predicated region fallthrough
CT: control target
= control target key end

     0   :  { %8 = vsyncpa [#allocation3], 0  ;;  %s738_s0 = inlined_call_operand.vmem [shape: f32[2,16,64], index: 0, kind: input, shape index: {}]   ;;  %s739_s1 = inlined_call_operand.vmem [shape: f32[16,1], index: 1, kind: input, shape index: {}]   ;;  %s740_s2 = inlined_call_operand.vmem [shape: f32[16,1], index: 2, kind: input, shape index: {}]   ;;  %s741_s3 = inlined_call_operand.hbm [shape: f32[2,16,64], index: 3, kind: output, shape index: {}]  }
   0x1   :  { %10 = vsyncpa [#allocation3 + $0x1], 0  ;;  %s603_s12 = smov 0   ;;  %s605_s13 = smov 0  }
   0x2   :  { %s607_s14 = smov 0   ;;  %s609_s15 = smov 0  }
   0x3   :  { %s611_s16 = smov 0   ;;  %s613_s17 = smov 0  }
   0x4 LB: > { %s416_s18 = sadd.s32 4294967295, %s578_s17   ;;  %s417_s19 = sadd.s32 4294967294, %s578_s17   ;;  %s578_s17 = sphi %s613_s17, %s16_s17   ;;  %s574_s16 = sphi %s611_s16, %s748_s16   ;;  %s570_s15 = sphi %s609_s15, %s747_s15   ;;  %s566_s14 = sphi %s607_s14, %s746_s14   ;;  %s562_s13 = sphi %s605_s13, %s745_s13   ;;  %s558_s12 = sphi %s603_s12, %s744_s12  }
   0x5   : > { %s28_s20 = sadd.s32 1, %s574_s16  ;;  %s107_s21 = sadd.s32 1, %s566_s14 }
   0x6   : > { %p30_p0 = scmp.ge.s32.totalorder %s28_s20, 2  ;;  %p117_p1 = scmp.ne.s32.totalorder %s566_s14, %s562_s13 }
   0x7   : > { %p118_p2 = scmp.eq.s32.totalorder %s416_s18, 1  ;;  %p123_p3 = scmp.ne.s32.totalorder %s562_s13, %s558_s12 }
   0x8   : > { %s750_s20 = smov (%p30_p0, %s28_s20), 0  ;;  %p124_p5 = scmp.eq.s32.totalorder %s417_s19, 1 }
   0x9   : > { %p643_p4 = por %p118_p2, %p117_p1  ;;  %s102_s23 = ssub.s32 %s574_s16, %s750_s20 }
   0xa   : > { %p420_p6 = scmp.ge.s32.totalorder %s578_s17, 1  ;;  %p105_p7 = scmp.eq.s32.totalorder %s102_s23, 0 }
   0xb   : > { %p650_p8 = por %p124_p5, %p123_p3  ;;  %p161_p9 = scmp.lt.s32.totalorder %s578_s17, 3 }
   0xc   : > { %s656_s25 = scalar_select %p105_p7, %s566_s14, %s107_s21  }
   0xd   : > { %p162_p10 = pnand %p420_p6, %p161_p9 }
   0xe   : > { %p190_p11 = scmp.lt.s32.totalorder (!%p162_p10), %s570_s15, 1  ;;  %s186_s18 = sand.u32 (!%p162_p10), 1, %s562_s13  }
   0xf   : > { %165 = sbr.rel (%p162_p10) target bundleno = 327 (0x147), region = 32  ;;  %s421_s19 = sshll.u32 (!%p162_p10), %s186_s18, 4 }
  0x10   : > { %s430_s21 = sshll.u32 (!%p162_p10), %s570_s15, 4  ;;  %s188_s23 = scalar_lea.vmem (!%p162_p10), [#allocation2], %s421_s19 }
  0x11   : > { %s333_s28 = scalar_lea.hbm (!%p162_p10), %s741_s3, %s430_s21  ;;  %s334_s29 = sshll.u32 (!%p162_p10), %s188_s23, 4  ;;  %s335_s29 = int_to_ptr.vmem [resolvable:$true] %s334_s29 }
  0x12   : > { %s520_s8 = scalar_lea.hbm (!%p162_p10), %s741_s3, 32 }
  0x14   : > { %s191_s26 = scalar_select %p190_p11, %s570_s15, 1  ;;  %vm204_vm0 = vcmask 523264   ;;  %v580_v13 = vmov 0   ;;  %v283_v54 = vld [vmem:[%s739_s1] sm:$0xff] }
  0x15   : > { %489 = vset.pattern.permute.xlu2 %v580_v13  ;;  %490 = vset.pattern.permute.xlu0 %v580_v13  ;;  %v285_v60 = vld [vmem:[%s740_s2] sm:$0xff]  ;;  %s320_s15 = scalar_lea.sflag [#allocation3], %s186_s18 }
  0x16   : > { %s429_s27 = sshll.u32 %s191_s26, 4  ;;  %491 = vset.pattern.permute.xlu1 %v580_v13 }
  0x17   : > { %s197_s30 = scalar_lea.vmem %s738_s0, %s429_s27 }
  0x18   : > { %v663_v0 = vld [vmem:[%s197_s30] sm:$0xff]  ;;  %v670_v4 = vld [vmem:[%s197_s30 + $0x8] sm:$0xff]  ;;  %s336_s30 = sshll.u32 %s333_s28, 4  ;;  %s337_s30 = int_to_ptr.hbm [resolvable:$true] %s336_s30 }
  0x19   : > { %v205_v1 = vsel %vm204_vm0, %v663_v0, 0.0  ;;  %v202_v2 = vmul.f32 %v663_v0, %v663_v0  ;;  %v203_v5 = vmul.f32 %v670_v4, %v670_v4  ;;  %v208_v6 = vsel %vm204_vm0, %v670_v4, 0.0  ;;  %s514_s4 = sshra.s32 %s337_s30, 4  ;;  %s515_s4 = int_to_ptr.hbm [resolvable:$true] %s514_s4 }
  0x1a   : > { %206 = vadd.xlane.f32.xlu0 %v205_v1  ;;  %s516_s5 = scalar_lea.hbm %s515_s4, 16  ;;  %p521_p1 = scmp.lt.s32.totalorder %s515_s4, %s741_s3 }
  0x1b   : > { %v211_v3 = vsel %vm204_vm0, %v202_v2, 0.0  ;;  %v214_v7 = vsel %vm204_vm0, %v203_v5, 0.0  ;;  %p517_p12 = scmp.ne.s32.totalorder %s515_s4, %s516_s5  ;;  %p522_p2 = scmp.lt.s32.totalorder %s520_s8, %s516_s5 }
  0x1c   : > { %212 = vadd.xlane.f32.xlu1 %v211_v3 }
  0x1d   : > { %p518_p13 = pnand %p517_p12, %p643_p4  ;;  %p523_p3 = por %p522_p2, %p521_p1 }
  0x1f   : > { %p519_p0 = pneg %p518_p13 }
  0x21   : > { %p524_p5 = pnand %p523_p3, %p519_p0 }
  0x22   : > { %209 = vadd.xlane.f32.xlu0 %v208_v6  ;;  %v284_v6 = vld [vmem:[%s739_s1 + $0x8] sm:$0xff] }
  0x24   : > { %215 = vadd.xlane.f32.xlu1 %v214_v7 }
  0x8d   : > { %v207_v8 = vpop.xlane.xlu0 %206 }
  0x8e   : > { %v677_v9 = vmul.f32 0.015625, %v207_v8 }
  0x8f   : > { %v213_v10 = vpop.xlane.xlu1 %212 }
  0x90   : > { %v219_v11 = vmul.f32 %v677_v9, %v207_v8 }
  0x92   : > { %v221_v12 = vsub.f32 %v213_v10, %v219_v11 }
  0x94   : > { %v223_v14 = vmax.f32 %v221_v12, 0.0 }
  0x95   : > { %v210_v15 = vpop.xlane.xlu0 %209 }
  0x96   : > { %v225_v16 = vmul.f32 0.015873017, %v223_v14  ;;  %v680_v17 = vmul.f32 0.015625, %v210_v15 }
  0x97   : > { %v216_v18 = vpop.xlane.xlu1 %215 }
  0x98   : > { %492 = vrsqrt.f32 %v225_v16  ;;  %v220_v19 = vmul.f32 %v680_v17, %v210_v15  ;;  %vm234_vm1 = vcmp.eq.f32.partialorder %v225_v16, inf  ;;  %v237_v33 = vand.u32 2147483648, %v225_v16 }
  0x99   : > { %vm236_vm2 = vcmp.eq.f32.partialorder %v225_v16, 0.0 }
  0x9a   : > { %v222_v20 = vsub.f32 %v216_v18, %v220_v19 }
  0x9c   : > { %v224_v21 = vmax.f32 %v222_v20, 0.0 }
  0x9e   : > { %v493_v22 = vpop.eup %492  ;;  %v226_v23 = vmul.f32 0.015873017, %v224_v21 }
  0x9f   : > { %v228_v24 = vmul.f32 %v493_v22, %v225_v16 }
  0xa0   : > { %494 = vrsqrt.f32 %v226_v23  ;;  %vm246_vm3 = vcmp.eq.f32.partialorder %v226_v23, inf  ;;  %v249_v41 = vand.u32 2147483648, %v226_v23  ;;  %vm248_vm4 = vcmp.eq.f32.partialorder %v226_v23, 0.0 }
  0xa1   : > { %v229_v25 = vmul.f32 %v493_v22, %v228_v24 }
  0xa3   : > { %v230_v26 = vmul.f32 0.5, %v229_v25 }
  0xa5   : > { %v231_v27 = vsub.f32 1.5, %v230_v26 }
  0xa6   : > { %v495_v28 = vpop.eup %494 }
  0xa7   : > { %v240_v29 = vmul.f32 %v495_v28, %v226_v23  ;;  %v232_v30 = vmul.f32 %v493_v22, %v231_v27 }
  0xa9   : > { %v241_v31 = vmul.f32 %v495_v28, %v240_v29  ;;  %v233_v32 = vmul.f32 %v232_v30, %v225_v16 }
  0xab   : > { %v242_v34 = vmul.f32 0.5, %v241_v31  ;;  %v235_v35 = vsel %vm234_vm1, %v225_v16, %v233_v32 }
  0xac   : > { %v238_v36 = vsel %vm236_vm2, %v237_v33, %v235_v35 }
  0xad   : > { %v243_v37 = vsub.f32 1.5, %v242_v34  ;;  %v251_v38 = vadd.f32 1e-10, %v238_v36 }
  0xaf   : > { %v244_v39 = vmul.f32 %v495_v28, %v243_v37  ;;  %496 = vrcp.f32 %v251_v38  ;;  %v264_v48 = vand.u32 2147483648, %v251_v38  ;;  %v262_v50 = vand.u32 2147483647, %v251_v38 }
  0xb0   : > { %vm258_vm6 = vweird.f32 %v251_v38 }
  0xb1   : > { %v245_v40 = vmul.f32 %v244_v39, %v226_v23  ;;  %v265_v53 = vor.u32 1.1754944e-38, %v264_v48  ;;  %vm263_vm8 = vcmp.eq.f32.partialorder %v262_v50, 8.507059e+37 }
  0xb3   : > { %v247_v42 = vsel %vm246_vm3, %v226_v23, %v245_v40 }
  0xb4   : > { %v250_v43 = vsel %vm248_vm4, %v249_v41, %v247_v42 }
  0xb5   : > { %v497_v44 = vpop.eup %496  ;;  %v252_v45 = vadd.f32 1e-10, %v250_v43 }
  0xb6   : > { %v254_v46 = vmul.f32 %v497_v44, %v251_v38  ;;  %vm259_vm5 = vweird.f32 %v497_v44 }
  0xb7   : > { %498 = vrcp.f32 %v252_v45  ;;  %vm260_vm7 = vmor %vm258_vm6, %vm259_vm5  ;;  %v279_v61 = vand.u32 2147483648, %v252_v45  ;;  %v277_v1 = vand.u32 2147483647, %v252_v45  ;;  %vm273_vm10 = vweird.f32 %v252_v45 }
  0xb8   : > { %v255_v47 = vsub.f32 1.0, %v254_v46 }
  0xb9   : > { %v280_v5 = vor.u32 1.1754944e-38, %v279_v61  ;;  %vm278_vm12 = vcmp.eq.f32.partialorder %v277_v1, 8.507059e+37 }
  0xba   : > { %v256_v49 = vmul.f32 %v497_v44, %v255_v47 }
  0xbc   : > { %v257_v51 = vadd.f32 %v497_v44, %v256_v49 }
  0xbd   : > { %v499_v52 = vpop.eup %498 }
  0xbe   : > { %v261_v55 = vsel %vm260_vm7, %v497_v44, %v257_v51  ;;  %v269_v56 = vmul.f32 %v499_v52, %v252_v45  ;;  %vm274_vm9 = vweird.f32 %v499_v52 }
  0xbf   : > { %v266_v57 = vsel %vm263_vm8, %v265_v53, %v261_v55  ;;  %vm275_vm11 = vmor %vm273_vm10, %vm274_vm9 }
  0xc0   : > { %v287_v58 = vmul.f32 %v283_v54, %v266_v57  ;;  %v270_v59 = vsub.f32 1.0, %v269_v56 }
  0xc2   : > { %295 = vperm.xlu2 %489, %v287_v58   ;;  %v289_v62 = vmul.f32 %v287_v58, %v677_v9  ;;  %v271_v63 = vmul.f32 %v499_v52, %v270_v59  ;;  %v286_v9 = vld [vmem:[%s740_s2 + $0x8] sm:$0xff] }
  0xc4   : > { %v291_v2 = vsub.f32 %v285_v60, %v289_v62  ;;  %v272_v3 = vadd.f32 %v499_v52, %v271_v63 }
  0xc6   : > { %307 = vperm.xlu0 %490, %v291_v2   ;;  %v276_v7 = vsel %vm275_vm11, %v499_v52, %v272_v3 }
  0xc7   : > { %v281_v8 = vsel %vm278_vm12, %v280_v5, %v276_v7 }
  0xc8   : > { %v288_v10 = vmul.f32 %v284_v6, %v281_v8 }
  0xca   : > { %300 = vperm.xlu2 %489, %v288_v10   ;;  %v290_v11 = vmul.f32 %v288_v10, %v680_v17 }
  0xcc   : > { %v292_v12 = vsub.f32 %v286_v9, %v290_v11 }
  0xce   : > { %312 = vperm.xlu1 %491, %v292_v12  }
 0x11c   : > { %v296_v13 = vpop.permute.xlu2 %295 }
 0x11d   : > { %v303_v14 = vmul.f32 %v296_v13, %v663_v0 }
 0x124   : > { %v301_v18 = vpop.permute.xlu2 %300 }
 0x125   : > { %v304_v17 = vmul.f32 %v301_v18, %v670_v4 }
 0x138   : > { %v308_v15 = vpop.permute.xlu0 %307 }
 0x139   : > { %v315_v16 = vadd.f32 %v308_v15, %v303_v14 }
 0x13b   : > { %317 = vst.msk [vmem:[%s188_s23] sm:$0xff] %vm204_vm0, %v315_v16 }
 0x140   : > { %v313_v19 = vpop.permute.xlu1 %312 }
 0x141   : > { %v316_v20 = vadd.f32 %v313_v19, %v304_v17 }
 0x143   : > { %318 = vst.msk [vmem:[%s188_s23 + $0x8] sm:$0xff] %vm204_vm0, %v316_v20 }
 0x144   : > { %527 = shalt.err (!%p524_p5)
}
 0x145   : > { %s581_s11 = smov 128   ;;  %s582_s18 = smov 8  }
 0x146   : > { %431 = dma.vmem_to_hbm [thread:$0]  (%p643_p4), %s335_s29, 256, %s337_s30, %s320_s15, %s581_s11, %s581_s11, %s582_s18  }
 0x147 PF: > { %p437_p6 = scmp.ge.s32.totalorder %s578_s17, 2  ;;  %s351_s19 = sand.u32 1, %s558_s12  }
 0x148   : > { %s352_s21 = scalar_lea.sflag [#allocation3], %s351_s19 }
 0x149   : > { %p434_p7 = pnand %p437_p6, %p650_p8 }
 0x14b   : > { %p435_p9 = pneg %p434_p7 }
 0x14d   : > { %553 = dma.done.wait (%p435_p9), %s352_s21, 256  }
 0x14e   : > { %555 = vsyncadd (%p435_p9), %s352_s21, 4294967040  ;;  %s16_s17 = sadd.s32 1, %s578_s17   ;;  %s744_s12 = smov %s562_s13 }
 0x14f   : > { %p13_p10 = scmp.ge.s32.totalorder %s16_s17, 4   ;;  %s745_s13 = smov %s566_s14 }
 0x150   : > { %s746_s14 = smov %s656_s25  ;;  %s747_s15 = smov %s574_s16 }
 0x151   : > { %s748_s16 = smov %s750_s20  ;;  %15 = sbr.rel (!%p13_p10) target bundleno = 4 (0x4), region = 67 }
 0x156   :  { %358 = vsyncpa [#allocation3], 1 }
 0x157   :  { %360 = vsyncpa [#allocation3 + $0x1], 1 }

</bundles_post_ra>
